<compile_context>
chip_gen: v7x
topology: tpu7x:2x2x1
jax: 0.10.0
libtpu: 0.0.40
codegen_flags: <defaults>
</compile_context>

<pallas_src>
import functools

import jax
import jax.numpy as jnp
from jax.experimental import pallas as pl
from jax.experimental.pallas import tpu as pltpu


def _round_up(x, m):
    return ((x + m - 1) // m) * m


def _stats_kernel(x_ref, g_ref, b_ref, scale_ref, shift_ref,
                  sum_sc, sq_sc, *, m_total, eps):
    """Accumulate per-channel sum / sum-of-squares over the M grid axis and
    finalize fused (scale, shift) on the last M step."""
    m = pl.program_id(1)

    @pl.when(m == 0)
    def _():
        sum_sc[...] = jnp.zeros_like(sum_sc)
        sq_sc[...] = jnp.zeros_like(sq_sc)

    x = x_ref[...].astype(jnp.float32)                 # (M_TILE, C_TILE)
    sum_sc[...] += jnp.sum(x, axis=0, keepdims=True)
    sq_sc[...] += jnp.sum(x * x, axis=0, keepdims=True)

    @pl.when(m == pl.num_programs(1) - 1)
    def _():
        inv_m = jnp.float32(1.0 / m_total)
        mean = sum_sc[...] * inv_m
        var = jnp.maximum(sq_sc[...] * inv_m - mean * mean, 0.0)  # biased var
        inv_std = jax.lax.rsqrt(var + jnp.float32(eps))
        scale = g_ref[...].astype(jnp.float32) * inv_std
        scale_ref[...] = scale
        shift_ref[...] = b_ref[...].astype(jnp.float32) - mean * scale


def _apply_kernel(x_ref, scale_ref, shift_ref, o_ref):
    """y = x * scale + shift (normalization and affine fused per channel)."""
    x = x_ref[...].astype(jnp.float32)
    o_ref[...] = (x * scale_ref[...] + shift_ref[...]).astype(o_ref.dtype)


def my_batch_norm(x, gamma, beta, eps=1e-5):
    """Forward of MyBatchNorm (training-mode batch statistics)."""
    if x.ndim not in (2, 3):
        raise ValueError("MyBatchNorm expects a 2D or 3D input")
    orig_shape = x.shape
    C = x.shape[-1]
    x2 = x.reshape(-1, C)                              # (M, C), M = N or B*L
    M = x2.shape[0]
    dtype = x2.dtype

    # ---- tile geometry ------------------------------------------------------
    C_pad = _round_up(C, 128)                          # lane-dense channel axis
    if C_pad % 512 == 0:
        C_TILE = 512
    elif C_pad % 256 == 0:
        C_TILE = 256
    else:
        C_TILE = 128
    M_TILE = min(512, _round_up(M, 8))                 # sublane tile (mult. of 8)
    M_pad = _round_up(M, M_TILE)
    n_c = C_pad // C_TILE
    n_m = M_pad // M_TILE

    # ---- pad operands (zeros in M-padding contribute nothing to the stats) --
    x_p = x2
    if (M_pad, C_pad) != (M, C):
        x_p = jnp.pad(x2, ((0, M_pad - M), (0, C_pad - C)))
    g_p = gamma.reshape(1, C).astype(jnp.float32)
    b_p = beta.reshape(1, C).astype(jnp.float32)
    if C_pad != C:
        g_p = jnp.pad(g_p, ((0, 0), (0, C_pad - C)), constant_values=1.0)
        b_p = jnp.pad(b_p, ((0, 0), (0, C_pad - C)))

    # VMEM budget sized from the chosen tiles (double-buffered in + out tiles
    # plus the tiny per-channel vectors), clamped well under v7x's 64 MiB.
    tile_bytes = M_TILE * C_TILE * jnp.dtype(dtype).itemsize
    vmem_limit = int(min(48 << 20, max(8 << 20, 6 * tile_bytes + (2 << 20))))

    # ---- phase 1: per-channel statistics -> fused (scale, shift) ------------
    scale, shift = pl.pallas_call(
        functools.partial(_stats_kernel, m_total=M, eps=eps),
        out_shape=(jax.ShapeDtypeStruct((1, C_pad), jnp.float32),
                   jax.ShapeDtypeStruct((1, C_pad), jnp.float32)),
        grid_spec=pltpu.PrefetchScalarGridSpec(
            num_scalar_prefetch=0,
            grid=(n_c, n_m),                           # reduction (M) axis last
            in_specs=[
                pl.BlockSpec((M_TILE, C_TILE), lambda c, m: (m, c)),
                pl.BlockSpec((1, C_TILE), lambda c, m: (0, c)),
                pl.BlockSpec((1, C_TILE), lambda c, m: (0, c)),
            ],
            out_specs=(
                pl.BlockSpec((1, C_TILE), lambda c, m: (0, c)),
                pl.BlockSpec((1, C_TILE), lambda c, m: (0, c)),
            ),
            scratch_shapes=[pltpu.VMEM((1, C_TILE), jnp.float32),
                            pltpu.VMEM((1, C_TILE), jnp.float32)]),
        compiler_params=pltpu.CompilerParams(
            dimension_semantics=("parallel", "arbitrary"),
            vmem_limit_bytes=vmem_limit),
    )(x_p, g_p, b_p)

    # ---- phase 2: streaming apply  y = x * scale + shift --------------------
    # NOTE: pipeline_mode=pl.Buffered(3) on the x spec is a candidate sweep for
    # v7x (compute per tile << tile DMA); default double-buffering kept here.
    out_p = pl.pallas_call(
        _apply_kernel,
        out_shape=jax.ShapeDtypeStruct((M_pad, C_pad), dtype),
        grid_spec=pltpu.PrefetchScalarGridSpec(
            num_scalar_prefetch=0,
            grid=(n_c, n_m),
            in_specs=[
                pl.BlockSpec((M_TILE, C_TILE), lambda c, m: (m, c)),
                pl.BlockSpec((1, C_TILE), lambda c, m: (0, c)),
                pl.BlockSpec((1, C_TILE), lambda c, m: (0, c)),
            ],
            out_specs=pl.BlockSpec((M_TILE, C_TILE), lambda c, m: (m, c))),
        compiler_params=pltpu.CompilerParams(
            dimension_semantics=("parallel", "parallel"),
            vmem_limit_bytes=vmem_limit),
    )(x_p, scale, shift)

    out = out_p[:M, :C] if (M_pad, C_pad) != (M, C) else out_p
    return out.reshape(orig_shape)


def _reference(x, gamma, beta, eps=1e-5):
    # Pure-JAX reference matching PyTorch BatchNorm1d training-mode forward.
    C = x.shape[-1]
    x2 = x.reshape(-1, C).astype(jnp.float32)
    mean = jnp.mean(x2, axis=0, keepdims=True)
    var = jnp.mean((x2 - mean) ** 2, axis=0, keepdims=True)
    y = (x2 - mean) / jnp.sqrt(var + eps) * gamma.reshape(1, C) + beta.reshape(1, C)
    return y.reshape(x.shape).astype(x.dtype)


if __name__ == "__main__":
    key = jax.random.PRNGKey(0)
    k_x3, k_x2, k_xl, k_g, k_b, k_gl, k_bl = jax.random.split(key, 7)

    n_features = 32  # BatchNorm1d(n)

    # BatchNorm1d defaults are gamma=1, beta=0; use random values so the
    # affine path is actually exercised.
    gamma = jax.random.normal(k_g, (n_features,), dtype=jnp.float32)
    beta = jax.random.normal(k_b, (n_features,), dtype=jnp.float32)

    # 3D path: (B, L, C) -> normalize per channel over (B, L)
    x3 = jax.random.normal(k_x3, (2, 8, n_features), dtype=jnp.float32)
    y3 = jax.block_until_ready(my_batch_norm(x3, gamma, beta))

    # 2D path: (N, C) -> normalize per channel over N
    x2 = jax.random.normal(k_x2, (16, n_features), dtype=jnp.float32)
    y2 = jax.block_until_ready(my_batch_norm(x2, gamma, beta))

    # Larger 2D case: exercises M-tiling (multiple "arbitrary" reduction steps)
    # and channel padding (160 -> 256 lanes).
    Cl = 160
    gamma_l = jax.random.normal(k_gl, (Cl,), dtype=jnp.float32)
    beta_l = jax.random.normal(k_bl, (Cl,), dtype=jnp.float32)
    xl = jax.random.normal(k_xl, (1040, Cl), dtype=jnp.float32)
    yl = jax.block_until_ready(my_batch_norm(xl, gamma_l, beta_l))

    # Sanity-check against pure-JAX reference.
    ref3 = _reference(x3, gamma, beta)
    ref2 = _reference(x2, gamma, beta)
    refl = _reference(xl, gamma_l, beta_l)
    assert jnp.max(jnp.abs(y3 - ref3)) < 1e-4
    assert jnp.max(jnp.abs(y2 - ref2)) < 1e-4
    assert jnp.max(jnp.abs(yl - refl)) < 2e-4

    print("KERNEL_OK")
</pallas_src>

<mosaic_0001>
module attributes {stable_mosaic.version = 11 : i64} {
  func.func @_stats_kernel(%arg0: i32, %arg1: i32, %arg2: memref<16x128xf32, #tpu.memory_space<vmem>>, %arg3: memref<1x128xf32, #tpu.memory_space<vmem>>, %arg4: memref<1x128xf32, #tpu.memory_space<vmem>>, %arg5: memref<1x128xf32, #tpu.memory_space<vmem>>, %arg6: memref<1x128xf32, #tpu.memory_space<vmem>>, %arg7: memref<1x128xf32, #tpu.memory_space<vmem>>, %arg8: memref<1x128xf32, #tpu.memory_space<vmem>>) attributes {dimension_semantics = [#tpu.dimension_semantics<parallel>, #tpu.dimension_semantics<arbitrary>], iteration_bounds = array<i64: 1, 1>, scalar_prefetch = 0 : i64, scratch_operands = 2 : i64, tpu.core_type = #tpu.core_type<tc>, window_params = [{transform_indices = @transform_0, window_bounds = array<i64: 16, 128>}, {transform_indices = @transform_1, window_bounds = array<i64: 1, 128>}, {transform_indices = @transform_2, window_bounds = array<i64: 1, 128>}, {transform_indices = @transform_3, window_bounds = array<i64: 1, 128>}, {transform_indices = @transform_4, window_bounds = array<i64: 1, 128>}]} {
    %c0_i32 = arith.constant 0 : i32
    %0 = arith.cmpi eq, %arg1, %c0_i32 : i32
    %1 = arith.extui %0 : i1 to i32
    %c0_i32_0 = arith.constant 0 : i32
    %2 = arith.cmpi ne, %1, %c0_i32_0 : i32
    scf.if %2 {
      %cst_13 = arith.constant 0.000000e+00 : f32
      %18 = vector.broadcast %cst_13 : f32 to vector<1x128xf32>
      %c0_14 = arith.constant 0 : index
      %c0_15 = arith.constant 0 : index
      %19 = vector.load %arg7[%c0_14, %c0_15] : memref<1x128xf32, #tpu.memory_space<vmem>>, vector<1x128xf32>
      tpu.vector_store %arg7[%c0_14, %c0_15], %18 {strides = array<i32>} : memref<1x128xf32, #tpu.memory_space<vmem>>, vector<1x128xf32>,
      %cst_16 = arith.constant 0.000000e+00 : f32
      %20 = vector.broadcast %cst_16 : f32 to vector<1x128xf32>
      %c0_17 = arith.constant 0 : index
      %c0_18 = arith.constant 0 : index
      %21 = vector.load %arg8[%c0_17, %c0_18] : memref<1x128xf32, #tpu.memory_space<vmem>>, vector<1x128xf32>
      tpu.vector_store %arg8[%c0_17, %c0_18], %20 {strides = array<i32>} : memref<1x128xf32, #tpu.memory_space<vmem>>, vector<1x128xf32>,
    } else {
    }
    %c0 = arith.constant 0 : index
    %c0_1 = arith.constant 0 : index
    %3 = vector.load %arg2[%c0, %c0_1] : memref<16x128xf32, #tpu.memory_space<vmem>>, vector<16x128xf32>
    %c0_2 = arith.constant 0 : index
    %c0_3 = arith.constant 0 : index
    %4 = vector.load %arg7[%c0_2, %c0_3] : memref<1x128xf32, #tpu.memory_space<vmem>>, vector<1x128xf32>
    %cst = arith.constant dense<0.000000e+00> : vector<128xf32>
    %5 = vector.multi_reduction <add>, %3, %cst [0] : vector<16x128xf32> to vector<128xf32>
    %6 = vector.shape_cast %5 : vector<128xf32> to vector<1x128xf32>
    %7 = arith.addf %4, %6 : vector<1x128xf32>
    %c0_4 = arith.constant 0 : index
    %c0_5 = arith.constant 0 : index
    %8 = vector.load %arg7[%c0_4, %c0_5] : memref<1x128xf32, #tpu.memory_space<vmem>>, vector<1x128xf32>
    tpu.vector_store %arg7[%c0_4, %c0_5], %7 {strides = array<i32>} : memref<1x128xf32, #tpu.memory_space<vmem>>, vector<1x128xf32>,
    %c0_6 = arith.constant 0 : index
    %c0_7 = arith.constant 0 : index
    %9 = vector.load %arg8[%c0_6, %c0_7] : memref<1x128xf32, #tpu.memory_space<vmem>>, vector<1x128xf32>
    %10 = arith.mulf %3, %3 : vector<16x128xf32>
    %cst_8 = arith.constant dense<0.000000e+00> : vector<128xf32>
    %11 = vector.multi_reduction <add>, %10, %cst_8 [0] : vector<16x128xf32> to vector<128xf32>
    %12 = vector.shape_cast %11 : vector<128xf32> to vector<1x128xf32>
    %13 = arith.addf %9, %12 : vector<1x128xf32>
    %c0_9 = arith.constant 0 : index
    %c0_10 = arith.constant 0 : index
    %14 = vector.load %arg8[%c0_9, %c0_10] : memref<1x128xf32, #tpu.memory_space<vmem>>, vector<1x128xf32>
    tpu.vector_store %arg8[%c0_9, %c0_10], %13 {strides = array<i32>} : memref<1x128xf32, #tpu.memory_space<vmem>>, vector<1x128xf32>,
    %c0_i32_11 = arith.constant 0 : i32
    %15 = arith.cmpi eq, %arg1, %c0_i32_11 : i32
    %16 = arith.extui %15 : i1 to i32
    %c0_i32_12 = arith.constant 0 : i32
    %17 = arith.cmpi ne, %16, %c0_i32_12 : i32
    scf.if %17 {
      %c0_13 = arith.constant 0 : index
      %c0_14 = arith.constant 0 : index
      %18 = vector.load %arg7[%c0_13, %c0_14] : memref<1x128xf32, #tpu.memory_space<vmem>>, vector<1x128xf32>
      %cst_15 = arith.constant 6.250000e-02 : f32
      %19 = vector.broadcast %cst_15 : f32 to vector<1x128xf32>
      %20 = arith.mulf %18, %19 : vector<1x128xf32>
      %c0_16 = arith.constant 0 : index
      %c0_17 = arith.constant 0 : index
      %21 = vector.load %arg8[%c0_16, %c0_17] : memref<1x128xf32, #tpu.memory_space<vmem>>, vector<1x128xf32>
      %cst_18 = arith.constant 6.250000e-02 : f32
      %22 = vector.broadcast %cst_18 : f32 to vector<1x128xf32>
      %23 = arith.mulf %21, %22 : vector<1x128xf32>
      %24 = arith.mulf %20, %20 : vector<1x128xf32>
      %25 = arith.subf %23, %24 : vector<1x128xf32>
      %cst_19 = arith.constant 0.000000e+00 : f32
      %26 = vector.broadcast %cst_19 : f32 to vector<1x128xf32>
      %27 = arith.maximumf %25, %26 : vector<1x128xf32>
      %cst_20 = arith.constant 9.99999974E-6 : f32
      %28 = vector.broadcast %cst_20 : f32 to vector<1x128xf32>
      %29 = arith.addf %27, %28 : vector<1x128xf32>
      %30 = math.rsqrt %29 : vector<1x128xf32>
      %c0_21 = arith.constant 0 : index
      %c0_22 = arith.constant 0 : index
      %31 = vector.load %arg3[%c0_21, %c0_22] : memref<1x128xf32, #tpu.memory_space<vmem>>, vector<1x128xf32>
      %32 = arith.mulf %31, %30 : vector<1x128xf32>
      %c0_23 = arith.constant 0 : index
      %c0_24 = arith.constant 0 : index
      %33 = vector.load %arg5[%c0_23, %c0_24] : memref<1x128xf32, #tpu.memory_space<vmem>>, vector<1x128xf32>
      tpu.vector_store %arg5[%c0_23, %c0_24], %32 {strides = array<i32>} : memref<1x128xf32, #tpu.memory_space<vmem>>, vector<1x128xf32>,
      %c0_25 = arith.constant 0 : index
      %c0_26 = arith.constant 0 : index
      %34 = vector.load %arg4[%c0_25, %c0_26] : memref<1x128xf32, #tpu.memory_space<vmem>>, vector<1x128xf32>
      %35 = arith.mulf %20, %32 : vector<1x128xf32>
      %36 = arith.subf %34, %35 : vector<1x128xf32>
      %c0_27 = arith.constant 0 : index
      %c0_28 = arith.constant 0 : index
      %37 = vector.load %arg6[%c0_27, %c0_28] : memref<1x128xf32, #tpu.memory_space<vmem>>, vector<1x128xf32>
      tpu.vector_store %arg6[%c0_27, %c0_28], %36 {strides = array<i32>} : memref<1x128xf32, #tpu.memory_space<vmem>>, vector<1x128xf32>,
    } else {
    }
    return
  }
  func.func @transform_0(%arg0: i32, %arg1: i32) -> (i32, i32) {
    %c0_i32 = arith.constant 0 : i32
    return %arg1, %arg0 : i32, i32
  }
  func.func @transform_1(%arg0: i32, %arg1: i32) -> (i32, i32) {
    %c0_i32 = arith.constant 0 : i32
    %c0_i32_0 = arith.constant 0 : i32
    return %c0_i32, %arg0 : i32, i32
  }
  func.func @transform_2(%arg0: i32, %arg1: i32) -> (i32, i32) {
    %c0_i32 = arith.constant 0 : i32
    %c0_i32_0 = arith.constant 0 : i32
    return %c0_i32, %arg0 : i32, i32
  }
  func.func @transform_3(%arg0: i32, %arg1: i32) -> (i32, i32) {
    %c0_i32 = arith.constant 0 : i32
    %c0_i32_0 = arith.constant 0 : i32
    return %c0_i32, %arg0 : i32, i32
  }
  func.func @transform_4(%arg0: i32, %arg1: i32) -> (i32, i32) {
    %c0_i32 = arith.constant 0 : i32
    %c0_i32_0 = arith.constant 0 : i32
    return %c0_i32, %arg0 : i32, i32
  }
}

</mosaic_0001>

<bundles_post_ra>
// kernel: tpu_custom_call.1
= control target key start
LH: loop header
LB: loop body
LE: loop exit
PB: predicated region body
PF: predicated region fallthrough
CT: control target
= control target key end

     0   :  { %10 = vsyncpa [#allocation5], 0  ;;  %s263_s0 = inlined_call_operand.hbm [shape: f32[16,128], index: 0, kind: input, shape index: {}]   ;;  %s264_s1 = inlined_call_operand.vmem [shape: f32[1,128], index: 1, kind: input, shape index: {}]   ;;  %s265_s2 = inlined_call_operand.vmem [shape: f32[1,128], index: 2, kind: input, shape index: {}]   ;;  %s266_s3 = inlined_call_operand.hbm [shape: f32[1,128], index: 3, kind: output, shape index: {0}]   ;;  %s267_s4 = inlined_call_operand.hbm [shape: f32[1,128], index: 4, kind: output, shape index: {1}]  }
   0x1   :  { %11 = vsyncpa [#allocation6], 0 }
   0x2   :  { %12 = vsyncpa [#allocation9], 0  ;;  %s190_s15 = smov [#allocation4]   ;;  %s118_s19 = scalar_lea.hbm %s263_s0, 256 }
   0x3   :  { %s18_s16 = sshll.u32 %s190_s15, 4  ;;  %p119_p0 = scmp.ne.s32.totalorder %s263_s0, %s118_s19  ;;  %s19_s16 = int_to_ptr.vmem [resolvable:$true] %s18_s16 }
   0x4   :  { %p122_p1 = scmp.lt.u32.totalorder %s118_s19, %s263_s0 }
   0x6   :  { %p124_p2 = pnand %p122_p1, %p119_p0 }
   0x8   :  { %127 = shalt.err (!%p124_p2)
}
   0x9   :  { %s128_s24 = scalar_lea.vmem %s19_s16, 256  ;;  %p133_p4 = scmp.lt.s32.totalorder %s19_s16, %s19_s16 }
   0xa   :  { %p129_p3 = scmp.ne.s32.totalorder %s19_s16, %s128_s24  ;;  %p134_p5 = scmp.lt.s32.totalorder %s128_s24, %s128_s24 }
   0xc   :  { %p135_p6 = por %p134_p5, %p133_p4 }
   0xe   :  { %p136_p7 = pnand %p135_p6, %p129_p3 }
  0x10   :  { %139 = shalt.err (!%p136_p7)
}
  0x11   :  { %s191_s25 = smov 128   ;;  %s192_s26 = smov 8  }
  0x12   :  { %24 = dma.hbm_to_vmem [thread:$0]  %s263_s0, 256, %s19_s16, [#allocation5], %s191_s25, %s191_s25, %s192_s26  }
  0x13   :  { %184 = dma.done.wait [#allocation5], 256  }
  0x14   :  { %185 = vsyncadd [#allocation5], 4294967040  ;;  %v193_v0 = vmov 0.0   ;;  %v38_v1 = vld [vmem:[#allocation4] sm:$0xff]  ;;  %v39_v2 = vld [vmem:[#allocation4 + $0x8] sm:$0xff]  ;;  %s194_s30 = smov [#allocation7]  }
  0x15   :  { %36 = vst [vmem:[#allocation2] sm:$0x1] %v193_v0  ;;  %37 = vst [vmem:[#allocation3] sm:$0x1] %v193_v0  ;;  %v41_v3 = vadd.f32 %v39_v2, %v38_v1  ;;  %v51_v4 = vmul.f32 %v38_v1, %v38_v1  ;;  %v52_v5 = vmul.f32 %v39_v2, %v39_v2  ;;  %v74_v31 = vld [vmem:[%s264_s1] sm:$0x1] }
  0x16   :  { %s87_s5 = sshll.u32 %s194_s30, 4  ;;  %v77_v34 = vld [vmem:[%s265_s2] sm:$0x1]  ;;  %s195_s8 = smov [#allocation8]   ;;  %s88_s5 = int_to_ptr.vmem [resolvable:$true] %s87_s5 }
  0x17   :  { %v42_v6 = vrot.slane %v41_v3, 4  ;;  %v53_v7 = vadd.f32 %v52_v5, %v51_v4  ;;  %s97_s9 = sshll.u32 %s195_s8, 4  ;;  %s140_s10 = scalar_lea.vmem %s88_s5, 16  ;;  %s98_s9 = int_to_ptr.vmem [resolvable:$true] %s97_s9 }
  0x18   :  { %p141_p8 = scmp.ne.s32.totalorder %s88_s5, %s140_s10  ;;  %s144_s11 = scalar_lea.vmem %s88_s5, 32 }
  0x19   :  { %v43_v8 = vadd.f32 %v42_v6, %v41_v3  ;;  %v54_v9 = vrot.slane %v53_v7, 4  ;;  %p145_p9 = scmp.lt.s32.totalorder %s88_s5, %s88_s5  ;;  %p146_p10 = scmp.lt.s32.totalorder %s144_s11, %s140_s10 }
  0x1b   :  { %v44_v10 = vrot.slane %v43_v8, 2  ;;  %v55_v11 = vadd.f32 %v54_v9, %v53_v7  ;;  %p147_p11 = por %p146_p10, %p145_p9 }
  0x1c   :  { %v40_v16 = vld [vmem:[#allocation2] sm:$0x1]  ;;  %v50_v19 = vld [vmem:[#allocation3] sm:$0x1] }
  0x1d   :  { %v45_v12 = vadd.f32 %v44_v10, %v43_v8  ;;  %v56_v13 = vrot.slane %v55_v11, 2  ;;  %p148_p12 = pnand %p147_p11, %p141_p8 }
  0x1f   :  { %v46_v14 = vrot.slane %v45_v12, 1  ;;  %v57_v15 = vadd.f32 %v56_v13, %v55_v11 }
  0x21   :  { %v47_v17 = vadd.f32 %v46_v14, %v45_v12  ;;  %v58_v18 = vrot.slane %v57_v15, 1 }
  0x23   :  { %v48_v20 = vadd.f32 %v47_v17, %v40_v16  ;;  %v59_v21 = vadd.f32 %v58_v18, %v57_v15 }
  0x25   :  { %49 = vst [vmem:[#allocation2] sm:$0x1] %v48_v20  ;;  %v60_v22 = vadd.f32 %v59_v21, %v50_v19 }
  0x27   :  { %61 = vst [vmem:[#allocation3] sm:$0x1] %v60_v22 }
  0x2c   :  { %v65_v23 = vld [vmem:[#allocation2] sm:$0x1] }
  0x2d   :  { %v66_v24 = vmul.f32 0.0625, %v65_v23 }
  0x2e   :  { %v67_v25 = vld [vmem:[#allocation3] sm:$0x1] }
  0x2f   :  { %v68_v26 = vmul.f32 0.0625, %v67_v25  ;;  %v69_v27 = vmul.f32 %v66_v24, %v66_v24 }
  0x31   :  { %v70_v28 = vsub.f32 %v68_v26, %v69_v27 }
  0x33   :  { %v71_v29 = vmax.f32 %v70_v28, 0.0 }
  0x35   :  { %v72_v30 = vadd.f32 1e-05, %v71_v29 }
  0x37   :  { %116 = vrsqrt.f32 %v72_v30 }
  0x41   :  { %v117_v32 = vpop.eup %116 }
  0x42   :  { %v75_v33 = vmul.f32 %v117_v32, %v74_v31 }
  0x44   :  { %76 = vst [vmem:[#allocation7] sm:$0x1] %v75_v33  ;;  %v78_v35 = vmul.f32 %v75_v33, %v66_v24 }
  0x45   :  { %151 = shalt.err (!%p148_p12)
}
  0x46   :  { %s152_s13 = scalar_lea.hbm %s266_s3, 16 }
  0x47   :  { %p153_p13 = scmp.ne.s32.totalorder %s266_s3, %s152_s13  ;;  %p156_p0 = scmp.lt.u32.totalorder %s152_s13, %s266_s3 }
  0x49   :  { %p158_p1 = pnand %p156_p0, %p153_p13 }
  0x4b   :  { %161 = shalt.err (!%p158_p1)
}
  0x4c   :  { %90 = dma.vmem_to_hbm [thread:$0]  %s88_s5, 16, %s266_s3, [#allocation6]   ;;  %v79_v36 = vsub.f32 %v77_v34, %v78_v35 }
  0x4d   :  { %s162_s19 = scalar_lea.vmem %s98_s9, 16  ;;  %s166_s20 = scalar_lea.vmem %s98_s9, 32 }
  0x4e   :  { %80 = vst [vmem:[#allocation8] sm:$0x1] %v79_v36  ;;  %p163_p2 = scmp.ne.s32.totalorder %s98_s9, %s162_s19  ;;  %p167_p3 = scmp.lt.s32.totalorder %s98_s9, %s98_s9 }
  0x4f   :  { %p168_p4 = scmp.lt.s32.totalorder %s166_s20, %s162_s19 }
  0x51   :  { %p169_p5 = por %p168_p4, %p167_p3 }
  0x53   :  { %p170_p6 = pnand %p169_p5, %p163_p2 }
  0x55   :  { %173 = shalt.err (!%p170_p6)
}
  0x56   :  { %s174_s23 = scalar_lea.hbm %s267_s4, 16 }
  0x57   :  { %p175_p7 = scmp.ne.s32.totalorder %s267_s4, %s174_s23  ;;  %p178_p8 = scmp.lt.u32.totalorder %s174_s23, %s267_s4 }
  0x59   :  { %p180_p9 = pnand %p178_p8, %p175_p7 }
  0x5b   :  { %183 = shalt.err (!%p180_p9)
}
  0x5c   :  { %100 = dma.vmem_to_hbm [thread:$0]  %s98_s9, 16, %s267_s4, [#allocation9]  }
  0x5d   :  { %186 = dma.done.wait [#allocation6], 16  }
  0x5e   :  { %187 = vsyncadd [#allocation6], 4294967280 }
  0x5f   :  { %188 = dma.done.wait [#allocation9], 16  }
  0x60   :  { %189 = vsyncadd [#allocation9], 4294967280 }
  0x61   :  { %107 = vsyncpa [#allocation5], 1 }
  0x62   :  { %108 = vsyncpa [#allocation6], 1 }
  0x63   :  { %109 = vsyncpa [#allocation9], 1 }

</bundles_post_ra>
